<compile_context>
chip_gen: v5e
topology: v5e:2x2
jax: 0.10.0
libtpu: 0.0.40
codegen_flags: <defaults>
</compile_context>

<pallas_src>
import functools

import jax
import jax.numpy as jnp
from jax.experimental import pallas as pl
from jax.experimental.pallas import tpu as pltpu


# -----------------------------------------------------------------------------
# Kernels.  x_ref / rnd_ref / o_ref blocks are (tN, tL); enc_ref block is
# (1, tL) and broadcasts over rows implicitly.
# -----------------------------------------------------------------------------
def _pe_eval_kernel(x_ref, enc_ref, o_ref):
    o_ref[...] = x_ref[...] + enc_ref[...]


def _pe_train_kernel(x_ref, enc_ref, rnd_ref, o_ref, *, p):
    # Inverted dropout: keep with prob (1 - p), scale kept values by 1/(1 - p).
    val = x_ref[...] + enc_ref[...]
    keep = rnd_ref[...] >= jnp.float32(p)
    scale = jnp.float32(1.0 / (1.0 - p))
    o_ref[...] = jnp.where(keep, val * scale, jnp.zeros_like(val)).astype(o_ref.dtype)


# -----------------------------------------------------------------------------
# Tiling.
# -----------------------------------------------------------------------------
_TARGET_TILE_BYTES = 2 * 1024 * 1024  # per-buffer tile budget; 3 streamed arrays
                                      # x/rnd/out double-buffered => ~12 MiB peak,
                                      # safe on v7x (32 MiB scoped / 64 MiB phys).
_MAX_TL = 8192                        # lane-axis tile cap (multiple of 128)


def _choose_tiles(n_rows, n_cols, itemsize):
    # Lane (last) axis: multiple of 128, or the full extent.
    tl = n_cols if n_cols <= _MAX_TL else _MAX_TL
    # Sublane (row) axis: multiple of 8, or the full extent, sized to budget.
    rows_budget = max(1, _TARGET_TILE_BYTES // (tl * itemsize))
    if n_rows <= max(8, rows_budget):
        tn = n_rows                               # full extent is always legal
    else:
        tn = max(8, (rows_budget // 8) * 8)       # multiple of 8
    return tn, tl


# -----------------------------------------------------------------------------
# Wrapper.
# -----------------------------------------------------------------------------
def positional_encoding(x, encoding_table, *, p=0.1, training=False, rng_key=None):
    """Forward of PositionalEncoding: dropout(x + encoding_table[:S]).

    x: (N, S, D) float32; encoding_table: (max_len, D) float32.
    """
    N, S, D = x.shape
    L = S * D

    use_dropout = bool(training) and p > 0.0
    if use_dropout and p >= 1.0:
        # PyTorch semantics: p == 1 zeroes the whole output.
        return jnp.zeros_like(x)

    # Lane-dense 2-D views: fold (S, D) -> S*D.
    xv = x.reshape(N, L)
    encv = encoding_table[:S].reshape(1, L)

    tn, tl = _choose_tiles(N, L, xv.dtype.itemsize)
    # Lane-tiles outer, row-tiles inner -> enc block index constant over the
    # inner loop, so the enc tile is DMA'd once per lane-tile, not once per row.
    grid = (pl.cdiv(L, tl), pl.cdiv(N, tn))

    data_spec = pl.BlockSpec((tn, tl), lambda j, i: (i, j))
    enc_spec = pl.BlockSpec((1, tl), lambda j, i: (0, j))
    out_shape = jax.ShapeDtypeStruct((N, L), x.dtype)
    cparams = pltpu.CompilerParams(dimension_semantics=("parallel", "parallel"))

    if not use_dropout:
        # NOTE: for very small problems a fused XLA add would beat the fixed
        # pallas_call overhead; kept as a kernel here so the path is exercised.
        out2d = pl.pallas_call(
            _pe_eval_kernel,
            out_shape=out_shape,
            grid=grid,
            in_specs=[data_spec, enc_spec],
            out_specs=data_spec,
            compiler_params=cparams,
        )(xv, encv)
        return out2d.reshape(N, S, D)

    # Training-mode dropout.  Uniforms are generated in the wrapper and streamed
    # through the kernel with the same tiling as x.
    # TODO(synk): use in-kernel pltpu.prng_random_bits + integer threshold when
    # targeting real TPUs only (saves one HBM read); it does not lower under
    # CPU-interpret, which is what broke the previous version.
    if rng_key is None:
        rng_key = jax.random.PRNGKey(0)
    rnd = jax.random.uniform(rng_key, (N, L), dtype=jnp.float32)

    kernel = functools.partial(_pe_train_kernel, p=float(p))
    out2d = pl.pallas_call(
        kernel,
        out_shape=out_shape,
        grid=grid,
        in_specs=[data_spec, enc_spec, data_spec],
        out_specs=data_spec,
        compiler_params=cparams,
    )(xv, encv, rnd)
    return out2d.reshape(N, S, D)


# -----------------------------------------------------------------------------
# Demo / correctness check.
# -----------------------------------------------------------------------------
if __name__ == "__main__":
    key = jax.random.PRNGKey(0)
    k_x, k_emb, k_drop = jax.random.split(key, 3)

    N, S, D = 2, 8, 32
    MAX_LEN = 64
    P = 0.1

    x = jax.random.normal(k_x, (N, S, D), dtype=jnp.float32)
    # nn.Embedding default init is N(0, 1); deterministic synthetic weights here.
    encoding_table = jax.random.normal(k_emb, (MAX_LEN, D), dtype=jnp.float32)

    ref = x + encoding_table[:S][None, :, :]

    # Eval mode: dropout is identity; deterministic check vs plain-JAX reference.
    out = positional_encoding(x, encoding_table, p=P, training=False)
    out = jax.block_until_ready(out)
    assert out.shape == (N, S, D)
    assert jnp.allclose(out, ref, atol=1e-6), "eval-mode mismatch vs reference"

    # Training mode: every element must be either 0 (dropped) or ref/(1-p) (kept).
    out_tr = positional_encoding(x, encoding_table, p=P, training=True, rng_key=k_drop)
    out_tr = jax.block_until_ready(out_tr)
    scale = 1.0 / (1.0 - P)
    ok = jnp.isclose(out_tr, 0.0, atol=1e-6) | jnp.isclose(
        out_tr, ref * scale, rtol=1e-5, atol=1e-5
    )
    assert bool(jnp.all(ok)), "training-mode dropout output inconsistent"

    print("KERNEL_OK")
</pallas_src>

<mosaic_0001>
module attributes {stable_mosaic.version = 11 : i64} {
  func.func @_pe_eval_kernel(%arg0: i32, %arg1: i32, %arg2: memref<2x256xf32, #tpu.memory_space<vmem>>, %arg3: memref<1x256xf32, #tpu.memory_space<vmem>>, %arg4: memref<2x256xf32, #tpu.memory_space<vmem>>) attributes {dimension_semantics = [#tpu.dimension_semantics<parallel>, #tpu.dimension_semantics<parallel>], iteration_bounds = array<i64: 1, 1>, scalar_prefetch = 0 : i64, scratch_operands = 0 : i64, tpu.core_type = #tpu.core_type<tc>, window_params = [{transform_indices = @transform_0, window_bounds = array<i64: 2, 256>}, {transform_indices = @transform_1, window_bounds = array<i64: 1, 256>}, {transform_indices = @transform_2, window_bounds = array<i64: 2, 256>}]} {
    %c0 = arith.constant 0 : index
    %c0_0 = arith.constant 0 : index
    %0 = vector.load %arg2[%c0, %c0_0] : memref<2x256xf32, #tpu.memory_space<vmem>>, vector<2x256xf32>
    %c0_1 = arith.constant 0 : index
    %c0_2 = arith.constant 0 : index
    %1 = vector.load %arg3[%c0_1, %c0_2] : memref<1x256xf32, #tpu.memory_space<vmem>>, vector<1x256xf32>
    %2 = vector.broadcast %1 : vector<1x256xf32> to vector<2x256xf32>
    %3 = arith.addf %0, %2 : vector<2x256xf32>
    %c0_3 = arith.constant 0 : index
    %c0_4 = arith.constant 0 : index
    %4 = vector.load %arg4[%c0_3, %c0_4] : memref<2x256xf32, #tpu.memory_space<vmem>>, vector<2x256xf32>
    tpu.vector_store %arg4[%c0_3, %c0_4], %3 {strides = array<i32>} : memref<2x256xf32, #tpu.memory_space<vmem>>, vector<2x256xf32>,
    return
  }
  func.func @transform_0(%arg0: i32, %arg1: i32) -> (i32, i32) {
    %c0_i32 = arith.constant 0 : i32
    return %arg1, %arg0 : i32, i32
  }
  func.func @transform_1(%arg0: i32, %arg1: i32) -> (i32, i32) {
    %c0_i32 = arith.constant 0 : i32
    %c0_i32_0 = arith.constant 0 : i32
    return %c0_i32, %arg0 : i32, i32
  }
  func.func @transform_2(%arg0: i32, %arg1: i32) -> (i32, i32) {
    %c0_i32 = arith.constant 0 : i32
    return %arg1, %arg0 : i32, i32
  }
}

</mosaic_0001>

<bundles_post_ra>
// kernel: tpu_custom_call.1
= control target key start
LH: loop header
LB: loop body
LE: loop exit
PB: predicated region body
PF: predicated region fallthrough
CT: control target
= control target key end

     0   :  { %7 = vsyncpa [#allocation3], 0  ;;  %s177_s0 = inlined_call_operand.hbm [shape: f32[2,256], index: 0, kind: input, shape index: {}]   ;;  %s178_s1 = inlined_call_operand.hbm [shape: f32[1,256], index: 1, kind: input, shape index: {}]   ;;  %s179_s2 = inlined_call_operand.hbm [shape: f32[2,256], index: 2, kind: output, shape index: {}]  }
   0x1   :  { %8 = vsyncpa [#allocation6], 0 }
   0x2   :  { %9 = vsyncpa [#allocation4], 0  ;;  %s15_s11 = sshll.u32 %s177_s0, 4  ;;  %s150_s12 = smov [#allocation2]   ;;  %s16_s11 = int_to_ptr.hbm [resolvable:$true] %s15_s11 }
   0x3   :  { %s17_s13 = sshll.u32 %s150_s12, 4  ;;  %s26_s16 = sshll.u32 %s178_s1, 4  ;;  %s18_s13 = int_to_ptr.vmem [resolvable:$true] %s17_s13  ;;  %s27_s16 = int_to_ptr.hbm [resolvable:$true] %s26_s16 }
   0x4   :  { %20 = dma.hbm_to_vmem [thread:$0]  %s16_s11, 64, %s18_s13, [#allocation3]  }
   0x5   :  { %s151_s17 = smov [#allocation5]  }
   0x6   :  { %s28_s18 = sshll.u32 %s151_s17, 4  ;;  %s29_s18 = int_to_ptr.vmem [resolvable:$true] %s28_s18 }
   0x7   :  { %31 = dma.hbm_to_vmem [thread:$0]  %s27_s16, 32, %s29_s18, [#allocation6]  }
   0x8   :  { %144 = dma.done.wait [#allocation3], 64  }
   0x9   :  { %145 = vsyncadd [#allocation3], 4294967232 }
   0xa   :  { %146 = dma.done.wait [#allocation6], 32  }
   0xb   :  { %147 = vsyncadd [#allocation6], 4294967264  ;;  %v41_v0 = vld [vmem:[#allocation5] sm:$0x3]  ;;  %vm46_vm0 = vcmask 1041408   ;;  %s152_s0 = smov [#allocation7]  }
   0xc   :  { %v43_v1 = vperm.slane %v41_v0, 0  ;;  %v44_v2 = vperm.slane %v41_v0, 1  ;;  %v40_v3 = vld [vmem:[#allocation2] sm:$0xf]  ;;  %s56_s19 = sshll.u32 %s152_s0, 4  ;;  %s58_s21 = sshll.u32 %s179_s2, 4  ;;  %s57_s19 = int_to_ptr.vmem [resolvable:$true] %s56_s19  ;;  %s59_s21 = int_to_ptr.hbm [resolvable:$true] %s58_s21 }
   0xe   :  { %v45_v4 = vrot.slane %v44_v2, 6 }
  0x10   :  { %v47_v5 = vsel %vm46_vm0, %v43_v1, %v45_v4 }
  0x11   :  { %v49_v6 = vadd.f32 %v47_v5, %v40_v3 }
  0x13   :  { %50 = vst [vmem:[#allocation7] sm:$0xf] %v49_v6 }
  0x14   :  { %61 = dma.vmem_to_hbm [thread:$0]  %s57_s19, 64, %s59_s21, [#allocation4]  }
  0x15   :  { %148 = dma.done.wait [#allocation4], 64  }
  0x16   :  { %149 = vsyncadd [#allocation4], 4294967232 }
  0x17   :  { %66 = vsyncpa [#allocation3], 1 }
  0x18   :  { %67 = vsyncpa [#allocation6], 1 }
  0x19   :  { %68 = vsyncpa [#allocation4], 1 }

</bundles_post_ra>
